<compile_context>
chip_gen: v5e
topology: v5e:2x2
jax: 0.10.0
libtpu: 0.0.40
codegen_flags: <defaults>
</compile_context>

<pallas_src>
import functools
import math

import jax
import jax.numpy as jnp
from jax.experimental import pallas as pl
from jax.experimental.pallas import tpu as pltpu


def _studentt_kl_kernel(df, inv_batch,
                        post_loc_ref, post_scale_ref, z_ref, chi2_ref,
                        prior_loc_ref, prior_logscale_ref,
                        out_ref, acc_ref):
    """One (rows, lanes) tile of sum[ log_q(sample) - log_p(sample) ].

    data refs  : (TR, L) VMEM (f32 or bf16, upcast here)
    prior refs : (1, L)  VMEM f32, broadcast over rows
    out_ref    : (1, 1)  SMEM f32 (written on the last grid step only)
    acc_ref    : (1,)    SMEM f32 (running sum across grid steps)
    """
    step = pl.program_id(0)

    @pl.when(step == 0)
    def _():
        acc_ref[0] = jnp.float32(0.0)

    f32 = jnp.float32
    c = f32(0.5 * (df + 1.0))
    inv_df = f32(1.0 / df)
    sqrt_df = f32(math.sqrt(df))

    post_loc = post_loc_ref[...].astype(f32)
    post_scale = post_scale_ref[...].astype(f32)
    z = z_ref[...].astype(f32)
    chi2 = chi2_ref[...].astype(f32)
    prior_loc = prior_loc_ref[...]                 # (1, L) f32
    prior_logscale = prior_logscale_ref[...]       # (1, L) f32
    inv_prior_scale = jnp.exp(-prior_logscale)     # (1, L): L exps, not TR*L divides

    # rsample: y = N(0,1) * rsqrt(Chi2(df)/df); sample = loc + scale * y.
    y = z * (sqrt_df * jax.lax.rsqrt(chi2))
    sample = post_loc + post_scale * y

    # log_q - log_p.  The Student-T log-normalizer is identical for both and cancels;
    # (sample - post_loc) / post_scale == y exactly, so log_q needs no divide.
    tp = (sample - prior_loc) * inv_prior_scale
    diff = (prior_logscale - jnp.log(post_scale)
            + c * (jnp.log1p(tp * tp * inv_df) - jnp.log1p(y * y * inv_df)))

    acc_ref[0] += jnp.sum(diff)

    @pl.when(step == pl.num_programs(0) - 1)
    def _():
        out_ref[0, 0] = acc_ref[0] * f32(inv_batch)


def _keep_or_f32(x):
    x = jnp.asarray(x)
    if x.dtype in (jnp.dtype(jnp.bfloat16), jnp.dtype(jnp.float32)):
        return x
    return x.astype(jnp.float32)


def _pick_block_rows(total_rows, cap):
    if total_rows <= cap:
        return total_rows
    tr = (cap // 8) * 8
    while tr >= 8:
        if total_rows % tr == 0:
            return tr
        tr -= 8
    # TODO(synk): no multiple-of-8 divisor <= cap; fall back to one big (unpipelined) block.
    return total_rows


def multivariate_studentt_kl(post_loc, post_scale, z, chi2,
                             prior_loc, prior_logscale, df, *, block_rows=512):
    """Scalar KL estimate: mean_b sum_d [ log q(sample) - log p(sample) ]."""
    B, D = post_loc.shape
    f32 = jnp.float32
    data = [_keep_or_f32(x) for x in (post_loc, post_scale, z, chi2)]
    p_loc = jnp.reshape(prior_loc, (1, D)).astype(f32)
    p_logscale = jnp.reshape(prior_logscale, (1, D)).astype(f32)

    lanes = 128
    if D <= lanes and lanes % D == 0 and (B * D) % lanes == 0:
        # Lane-dense repacking: (B, D) -> (B*D/128, 128); prior rows tiled to 128 lanes.
        reps = lanes // D
        rows = (B * D) // lanes
        data = [x.reshape(rows, lanes) for x in data]
        p_loc = jnp.tile(p_loc, (1, reps))
        p_logscale = jnp.tile(p_logscale, (1, reps))
        L = lanes
    else:
        # TODO(synk): D that is neither a divisor nor a multiple of 128 stays in the
        # (B, D) layout; lane utilization is D/128 when D < 128.
        rows, L = B, D

    tr = _pick_block_rows(rows, block_rows)   # (tr, 128) f32 x 4 inputs x 2 bufs fits all gens
    grid = (rows // tr,)

    kernel = functools.partial(_studentt_kl_kernel, float(df), 1.0 / float(B))
    out = pl.pallas_call(
        kernel,
        out_shape=jax.ShapeDtypeStruct((1, 1), f32),
        grid=grid,
        in_specs=[pl.BlockSpec((tr, L), lambda i: (i, 0))] * 4
        + [pl.BlockSpec((1, L), lambda i: (0, 0))] * 2,
        out_specs=pl.BlockSpec((1, 1), lambda i: (0, 0),
                               memory_space=pltpu.MemorySpace.SMEM),
        scratch_shapes=[pltpu.SMEM((1,), f32)],
        compiler_params=pltpu.CompilerParams(
            dimension_semantics=("arbitrary",)),   # accumulated across the row axis
    )(*data, p_loc, p_logscale)
    return out[0, 0]


if __name__ == "__main__":
    # Module config (mirrors __init__(loc, scale, df, shape)); note the torch code
    # initializes BOTH loc and logscale from `scale` (the loc arg is unused).
    scale = 0.1
    df = 5
    D = 64   # event dim ("shape")
    B = 8    # batch

    prior_loc = jnp.ones((D,), jnp.float32) * scale
    prior_logscale = jnp.log(jnp.ones((D,), jnp.float32) * scale)

    key = jax.random.PRNGKey(0)
    k1, k2, k3, k4 = jax.random.split(key, 4)
    post_loc = jax.random.normal(k1, (B, D), jnp.float32)
    post_scale = jax.nn.softplus(jax.random.normal(k2, (B, D), jnp.float32)) + 1e-3

    # Reparameterization noise for posterior.rsample():
    # TODO(synk): PyTorch's global PRNG stream cannot be reproduced; the normal and
    # chi-square driving noise is drawn with jax.random here and consumed inside the
    # kernel (rejection-sampled chi-square/gamma draws have no clean Pallas equivalent).
    z = jax.random.normal(k3, (B, D), jnp.float32)
    chi2 = jax.random.chisquare(k4, df, (B, D)).astype(jnp.float32)

    kl = multivariate_studentt_kl(post_loc, post_scale, z, chi2,
                                  prior_loc, prior_logscale, df)
    jax.block_until_ready(kl)

    # Pure-JAX reference of the same math (torch StudentT log_prob formula).
    def _ref():
        y = z * jax.lax.rsqrt(chi2 / df)
        sample = post_loc + post_scale * y
        c = (math.lgamma(0.5 * (df + 1)) - math.lgamma(0.5 * df)
             - 0.5 * math.log(df * math.pi))
        lq = c - jnp.log(post_scale) - 0.5 * (df + 1) * jnp.log1p(
            ((sample - post_loc) / post_scale) ** 2 / df)
        ps = jnp.exp(prior_logscale)
        lp = c - prior_logscale - 0.5 * (df + 1) * jnp.log1p(
            ((sample - prior_loc) / ps) ** 2 / df)
        return jnp.mean(jnp.sum(lq - lp, axis=-1))

    ref = _ref()
    assert jnp.allclose(kl, ref, rtol=1e-4, atol=1e-4), (kl, ref)
    print("KERNEL_OK")
</pallas_src>

<mosaic_0001>
module attributes {stable_mosaic.version = 11 : i64} {
  func.func @_studentt_kl_kernel(%arg0: i32, %arg1: memref<4x128xf32, #tpu.memory_space<vmem>>, %arg2: memref<4x128xf32, #tpu.memory_space<vmem>>, %arg3: memref<4x128xf32, #tpu.memory_space<vmem>>, %arg4: memref<4x128xf32, #tpu.memory_space<vmem>>, %arg5: memref<1x128xf32, #tpu.memory_space<vmem>>, %arg6: memref<1x128xf32, #tpu.memory_space<vmem>>, %arg7: memref<1x1xf32, #tpu.memory_space<smem>>, %arg8: memref<1xf32, #tpu.memory_space<smem>>) attributes {dimension_semantics = [#tpu.dimension_semantics<arbitrary>], iteration_bounds = array<i64: 1>, scalar_prefetch = 0 : i64, scratch_operands = 1 : i64, tpu.core_type = #tpu.core_type<tc>, window_params = [{transform_indices = @transform_0, window_bounds = array<i64: 4, 128>}, {transform_indices = @transform_1, window_bounds = array<i64: 4, 128>}, {transform_indices = @transform_2, window_bounds = array<i64: 4, 128>}, {transform_indices = @transform_3, window_bounds = array<i64: 4, 128>}, {pipeline_mode = #tpu.pipeline_mode<synchronous>, transform_indices = @transform_4, window_bounds = array<i64: 1, 128>}, {pipeline_mode = #tpu.pipeline_mode<synchronous>, transform_indices = @transform_5, window_bounds = array<i64: 1, 128>}, {transform_indices = @transform_6, window_bounds = array<i64: 1, 1>}]} {
    %c0_i32 = arith.constant 0 : i32
    %0 = arith.cmpi eq, %arg0, %c0_i32 : i32
    %1 = arith.extui %0 : i1 to i32
    %c0_i32_0 = arith.constant 0 : i32
    %2 = arith.cmpi ne, %1, %c0_i32_0 : i32
    scf.if %2 {
      %cst_21 = arith.constant 0.000000e+00 : f32
      %c0_22 = arith.constant 0 : index
      %47 = memref.load %arg8[%c0_22] : memref<1xf32, #tpu.memory_space<smem>>
      memref.store %cst_21, %arg8[%c0_22] : memref<1xf32, #tpu.memory_space<smem>>
    } else {
    }
    %c0 = arith.constant 0 : index
    %c0_1 = arith.constant 0 : index
    %3 = vector.load %arg1[%c0, %c0_1] : memref<4x128xf32, #tpu.memory_space<vmem>>, vector<4x128xf32>
    %c0_2 = arith.constant 0 : index
    %c0_3 = arith.constant 0 : index
    %4 = vector.load %arg2[%c0_2, %c0_3] : memref<4x128xf32, #tpu.memory_space<vmem>>, vector<4x128xf32>
    %c0_4 = arith.constant 0 : index
    %c0_5 = arith.constant 0 : index
    %5 = vector.load %arg3[%c0_4, %c0_5] : memref<4x128xf32, #tpu.memory_space<vmem>>, vector<4x128xf32>
    %c0_6 = arith.constant 0 : index
    %c0_7 = arith.constant 0 : index
    %6 = vector.load %arg4[%c0_6, %c0_7] : memref<4x128xf32, #tpu.memory_space<vmem>>, vector<4x128xf32>
    %c0_8 = arith.constant 0 : index
    %c0_9 = arith.constant 0 : index
    %7 = vector.load %arg5[%c0_8, %c0_9] : memref<1x128xf32, #tpu.memory_space<vmem>>, vector<1x128xf32>
    %c0_10 = arith.constant 0 : index
    %c0_11 = arith.constant 0 : index
    %8 = vector.load %arg6[%c0_10, %c0_11] : memref<1x128xf32, #tpu.memory_space<vmem>>, vector<1x128xf32>
    %cst = arith.constant 0.000000e+00 : f32
    %9 = vector.broadcast %cst : f32 to vector<1x128xf32>
    %10 = arith.subf %9, %8 : vector<1x128xf32>
    %11 = math.exp %10 : vector<1x128xf32>
    %12 = math.rsqrt %6 : vector<4x128xf32>
    %cst_12 = arith.constant 2.23606801 : f32
    %13 = vector.broadcast %cst_12 : f32 to vector<4x128xf32>
    %14 = arith.mulf %13, %12 : vector<4x128xf32>
    %15 = arith.mulf %5, %14 : vector<4x128xf32>
    %16 = arith.mulf %4, %15 : vector<4x128xf32>
    %17 = arith.addf %3, %16 : vector<4x128xf32>
    %18 = vector.broadcast %7 : vector<1x128xf32> to vector<4x128xf32>
    %19 = arith.subf %17, %18 : vector<4x128xf32>
    %20 = vector.broadcast %11 : vector<1x128xf32> to vector<4x128xf32>
    %21 = arith.mulf %19, %20 : vector<4x128xf32>
    %22 = math.log %4 : vector<4x128xf32>
    %23 = vector.broadcast %8 : vector<1x128xf32> to vector<4x128xf32>
    %24 = arith.subf %23, %22 : vector<4x128xf32>
    %25 = arith.mulf %21, %21 : vector<4x128xf32>
    %cst_13 = arith.constant 2.000000e-01 : f32
    %26 = vector.broadcast %cst_13 : f32 to vector<4x128xf32>
    %27 = arith.mulf %25, %26 : vector<4x128xf32>
    %28 = math.log1p %27 : vector<4x128xf32>
    %29 = arith.mulf %15, %15 : vector<4x128xf32>
    %cst_14 = arith.constant 2.000000e-01 : f32
    %30 = vector.broadcast %cst_14 : f32 to vector<4x128xf32>
    %31 = arith.mulf %29, %30 : vector<4x128xf32>
    %32 = math.log1p %31 : vector<4x128xf32>
    %33 = arith.subf %28, %32 : vector<4x128xf32>
    %cst_15 = arith.constant 3.000000e+00 : f32
    %34 = vector.broadcast %cst_15 : f32 to vector<4x128xf32>
    %35 = arith.mulf %34, %33 : vector<4x128xf32>
    %36 = arith.addf %24, %35 : vector<4x128xf32>
    %c0_16 = arith.constant 0 : index
    %37 = memref.load %arg8[%c0_16] : memref<1xf32, #tpu.memory_space<smem>>
    %38 = vector.shape_cast %36 : vector<4x128xf32> to vector<1x4x128xf32>
    %cst_17 = arith.constant dense<0.000000e+00> : vector<1xf32>
    %39 = vector.multi_reduction <add>, %38, %cst_17 [1, 2] : vector<1x4x128xf32> to vector<1xf32>
    %40 = vector.shape_cast %39 : vector<1xf32> to vector<1x1x1xf32>
    %41 = vector.extract %40[0, 0, 0] : f32 from vector<1x1x1xf32>
    %42 = arith.addf %37, %41 : f32
    %c0_18 = arith.constant 0 : index
    %43 = memref.load %arg8[%c0_18] : memref<1xf32, #tpu.memory_space<smem>>
    memref.store %42, %arg8[%c0_18] : memref<1xf32, #tpu.memory_space<smem>>
    %c0_i32_19 = arith.constant 0 : i32
    %44 = arith.cmpi eq, %arg0, %c0_i32_19 : i32
    %45 = arith.extui %44 : i1 to i32
    %c0_i32_20 = arith.constant 0 : i32
    %46 = arith.cmpi ne, %45, %c0_i32_20 : i32
    scf.if %46 {
      %c0_21 = arith.constant 0 : index
      %47 = memref.load %arg8[%c0_21] : memref<1xf32, #tpu.memory_space<smem>>
      %cst_22 = arith.constant 1.250000e-01 : f32
      %48 = arith.mulf %47, %cst_22 : f32
      %c0_23 = arith.constant 0 : index
      %c0_24 = arith.constant 0 : index
      %49 = memref.load %arg7[%c0_23, %c0_24] : memref<1x1xf32, #tpu.memory_space<smem>>
      memref.store %48, %arg7[%c0_23, %c0_24] : memref<1x1xf32, #tpu.memory_space<smem>>
    } else {
    }
    return
  }
  func.func @transform_0(%arg0: i32) -> (i32, i32) {
    %c0_i32 = arith.constant 0 : i32
    %c0_i32_0 = arith.constant 0 : i32
    return %arg0, %c0_i32 : i32, i32
  }
  func.func @transform_1(%arg0: i32) -> (i32, i32) {
    %c0_i32 = arith.constant 0 : i32
    %c0_i32_0 = arith.constant 0 : i32
    return %arg0, %c0_i32 : i32, i32
  }
  func.func @transform_2(%arg0: i32) -> (i32, i32) {
    %c0_i32 = arith.constant 0 : i32
    %c0_i32_0 = arith.constant 0 : i32
    return %arg0, %c0_i32 : i32, i32
  }
  func.func @transform_3(%arg0: i32) -> (i32, i32) {
    %c0_i32 = arith.constant 0 : i32
    %c0_i32_0 = arith.constant 0 : i32
    return %arg0, %c0_i32 : i32, i32
  }
  func.func @transform_4(%arg0: i32) -> (i32, i32) {
    %c0_i32 = arith.constant 0 : i32
    %c0_i32_0 = arith.constant 0 : i32
    %c0_i32_1 = arith.constant 0 : i32
    return %c0_i32, %c0_i32_0 : i32, i32
  }
  func.func @transform_5(%arg0: i32) -> (i32, i32) {
    %c0_i32 = arith.constant 0 : i32
    %c0_i32_0 = arith.constant 0 : i32
    %c0_i32_1 = arith.constant 0 : i32
    return %c0_i32, %c0_i32_0 : i32, i32
  }
  func.func @transform_6(%arg0: i32) -> (i32, i32) {
    %c0_i32 = arith.constant 0 : i32
    %c0_i32_0 = arith.constant 0 : i32
    %c0_i32_1 = arith.constant 0 : i32
    return %c0_i32, %c0_i32_0 : i32, i32
  }
}

</mosaic_0001>

<bundles_post_ra>
// kernel: tpu_custom_call.1
= control target key start
LH: loop header
LB: loop body
LE: loop exit
PB: predicated region body
PF: predicated region fallthrough
CT: control target
= control target key end

     0   :  { %11 = vsyncpa [#allocation4], 0  ;;  %s386_s0 = inlined_call_operand.hbm [shape: f32[4,128], index: 0, kind: input, shape index: {}]   ;;  %s387_s1 = inlined_call_operand.hbm [shape: f32[4,128], index: 1, kind: input, shape index: {}]   ;;  %s388_s2 = inlined_call_operand.hbm [shape: f32[4,128], index: 2, kind: input, shape index: {}]   ;;  %s389_s3 = inlined_call_operand.hbm [shape: f32[4,128], index: 3, kind: input, shape index: {}]   ;;  %s390_s4 = inlined_call_operand.vmem [shape: f32[1,128], index: 4, kind: input, shape index: {}]   ;;  %s391_s5 = inlined_call_operand.vmem [shape: f32[1,128], index: 5, kind: input, shape index: {}]   ;;  %s392_s6 = inlined_call_operand.hbm [shape: f32[1,1], index: 6, kind: output, shape index: {}]  }
   0x1   :  { %12 = vsyncpa [#allocation7], 0 }
   0x2   :  { %13 = vsyncpa [#allocation10], 0  ;;  %s31_s23 = sshll.u32 %s387_s1, 4  ;;  %s32_s23 = int_to_ptr.hbm [resolvable:$true] %s31_s23 }
   0x3   :  { %14 = vsyncpa [#allocation5], 0  ;;  %s322_s24 = smov [#allocation6]   ;;  %s20_s28 = sshll.u32 %s386_s0, 4  ;;  %s21_s28 = int_to_ptr.hbm [resolvable:$true] %s20_s28 }
   0x4   :  { %s33_s25 = sshll.u32 %s322_s24, 4  ;;  %s323_s29 = smov [#allocation3]   ;;  %s34_s25 = int_to_ptr.vmem [resolvable:$true] %s33_s25 }
   0x5   :  { %36 = dma.hbm_to_vmem [thread:$0]  %s32_s23, 64, %s34_s25, [#allocation7]  }
   0x6   :  { %s22_s30 = sshll.u32 %s323_s29, 4  ;;  %s42_s9 = sshll.u32 %s388_s2, 4  ;;  %s23_s30 = int_to_ptr.vmem [resolvable:$true] %s22_s30  ;;  %s43_s9 = int_to_ptr.hbm [resolvable:$true] %s42_s9 }
   0x7   :  { %25 = dma.hbm_to_vmem [thread:$0]  %s21_s28, 64, %s23_s30, [#allocation4]  }
   0x8   :  { %s53_s11 = sshll.u32 %s389_s3, 4  ;;  %s324_s12 = smov [#allocation8]   ;;  %s54_s11 = int_to_ptr.hbm [resolvable:$true] %s53_s11 }
   0x9   :  { %s44_s13 = sshll.u32 %s324_s12, 4  ;;  %s325_s0 = smov [#allocation9]   ;;  %s45_s13 = int_to_ptr.vmem [resolvable:$true] %s44_s13 }
   0xa   :  { %47 = dma.hbm_to_vmem [thread:$0]  %s43_s9, 64, %s45_s13, [#allocation7]  }
   0xb   :  { %s55_s14 = sshll.u32 %s325_s0, 4  ;;  %s56_s14 = int_to_ptr.vmem [resolvable:$true] %s55_s14 }
   0xc   :  { %58 = dma.hbm_to_vmem [thread:$0]  %s54_s11, 64, %s56_s14, [#allocation10]  }
   0xd   :  { %314 = dma.done.wait [#allocation4], 64  }
   0xe   :  { %315 = vsyncadd [#allocation4], 4294967232 }
   0xf   :  { %316 = dma.done.wait [#allocation7], 128  }
  0x10   :  { %317 = vsyncadd [#allocation7], 4294967168 }
  0x11   :  { %318 = dma.done.wait [#allocation10], 64  }
  0x12   :  { %319 = vsyncadd [#allocation10], 4294967232  ;;  %v88_v0 = vld [vmem:[#allocation9] sm:$0xf]  ;;  %v90_v1 = vld [vmem:[%s391_s5] sm:$0x1] }
  0x13   :  { %196 = vrsqrt.f32 %v88_v0  ;;  %v91_v3 = vsub.f32 0.0, %v90_v1  ;;  %vm100_vm0 = vweird.f32 %v88_v0  ;;  %v87_v10 = vld [vmem:[#allocation8] sm:$0xf]  ;;  %v86_v13 = vld [vmem:[#allocation6] sm:$0xf]  ;;  %vm148_vm5 = vcmask 1043456  }
  0x14   :  { %v85_v16 = vld [vmem:[#allocation3] sm:$0xf]  ;;  %s174_s19 = sshll.u32 %s392_s6, 4  ;;  %s326_s22 = smov [#allocation11]   ;;  %s175_s19 = int_to_ptr.hbm [resolvable:$true] %s174_s19 }
  0x15   :  { %v92_v6 = vmul.f32 1.442695, %v91_v3  ;;  %v194_v18 = vld [vmem:[%s390_s4] ss:$0 sm:$0xff] }
  0x16   :  { %v195_v42 = vld [vmem:[%s391_s5] ss:$0 sm:$0xff] }
  0x17   :  { %198 = vpow2.f32 %v92_v6 }
  0x19   :  { %v197_v2 = vpop.eup %196 }
  0x1a   :  { %v95_v4 = vmul.f32 %v197_v2, %v88_v0  ;;  %vm101_vm1 = vweird.f32 %v197_v2 }
  0x1b   :  { %vm102_vm2 = vmor %vm100_vm0, %vm101_vm1 }
  0x1c   :  { %v96_v5 = vmul.f32 %v197_v2, %v95_v4 }
  0x1d   :  { %v199_v15 = vpop.eup %198 }
  0x1e   :  { %v97_v7 = vmul.f32 0.5, %v96_v5  ;;  %v113_v21 = vperm.slane %v199_v15, 0 }
  0x20   :  { %v98_v8 = vsub.f32 1.5, %v97_v7 }
  0x22   :  { %v99_v9 = vmul.f32 %v197_v2, %v98_v8 }
  0x24   :  { %v103_v11 = vsel %vm102_vm2, %v197_v2, %v99_v9 }
  0x25   :  { %v104_v12 = vmul.f32 2.236068, %v103_v11 }
  0x27   :  { %v105_v14 = vmul.f32 %v104_v12, %v87_v10 }
  0x29   :  { %v106_v17 = vmul.f32 %v105_v14, %v86_v13  ;;  %v133_v19 = vmul.f32 %v105_v14, %v105_v14 }
  0x2b   :  { %v107_v20 = vadd.f32 %v106_v17, %v85_v16  ;;  %v134_v22 = vmul.f32 0.2, %v133_v19 }
  0x2d   :  { %v111_v23 = vsub.f32 %v107_v20, %v194_v18  ;;  %v135_v24 = vadd.f32 1.0, %v134_v22  ;;  %v138_v27 = vmul.f32 -0.5, %v134_v22  ;;  %v141_v33 = vand.u32 2147483647, %v134_v22 }
  0x2f   :  { %v115_v25 = vmul.f32 %v113_v21, %v111_v23  ;;  %200 = vlog2.f32 %v135_v24  ;;  %v139_v31 = vadd.f32 1.0, %v138_v27  ;;  %vm142_vm3 = vcmp.lt.f32.partialorder %v141_v33, 0.0004427343 }
  0x30   :  { %202 = vlog2.f32 %v86_v13 }
  0x31   :  { %v122_v26 = vmul.f32 %v115_v25, %v115_v25  ;;  %v140_v38 = vmul.f32 %v139_v31, %v134_v22 }
  0x33   :  { %v123_v28 = vmul.f32 0.2, %v122_v26 }
  0x35   :  { %v124_v29 = vadd.f32 1.0, %v123_v28  ;;  %v127_v30 = vmul.f32 -0.5, %v123_v28  ;;  %v201_v32 = vpop.eup %200  ;;  %v130_v35 = vand.u32 2147483647, %v123_v28 }
  0x36   :  { %v203_v36 = vpop.eup %202  ;;  %v137_v37 = vmul.f32 0.6931472, %v201_v32 }
  0x37   :  { %204 = vlog2.f32 %v124_v29  ;;  %v128_v34 = vadd.f32 1.0, %v127_v30  ;;  %v117_v41 = vmul.f32 0.6931472, %v203_v36  ;;  %vm131_vm4 = vcmp.lt.f32.partialorder %v130_v35, 0.0004427343 }
  0x38   :  { %v143_v44 = vsel %vm142_vm3, %v140_v38, %v137_v37 }
  0x39   :  { %v129_v39 = vmul.f32 %v128_v34, %v123_v28  ;;  %v121_v46 = vsub.f32 %v195_v42, %v117_v41 }
  0x3d   :  { %v205_v40 = vpop.eup %204 }
  0x3e   :  { %v126_v43 = vmul.f32 0.6931472, %v205_v40 }
  0x40   :  { %v132_v45 = vsel %vm131_vm4, %v129_v39, %v126_v43 }
  0x41   :  { %v144_v47 = vsub.f32 %v132_v45, %v143_v44 }
  0x43   :  { %v145_v48 = vmul.f32 3.0, %v144_v47 }
  0x45   :  { %v146_v49 = vadd.f32 %v145_v48, %v121_v46 }
  0x47   :  { %v149_v50 = vsel %vm148_vm5, %v146_v49, 0.0 }
  0x48   :  { %150 = vadd.xlane.f32.xlu0 %v149_v50 }
  0xbb   :  { %v151_v51 = vpop.xlane.xlu0 %150 }
  0xbc   :  { %v152_v52 = vrot.slane %v151_v51, 4 }
  0xbe   :  { %v153_v53 = vadd.f32 %v152_v52, %v151_v51 }
  0xc0   :  { %v154_v54 = vrot.slane %v153_v53, 2 }
  0xc2   :  { %v155_v55 = vadd.f32 %v154_v54, %v153_v53 }
  0xc4   :  { %v156_v56 = vrot.slane %v155_v55, 1 }
  0xc6   :  { %v157_v57 = vadd.f32 %v156_v56, %v155_v55 }
  0xc8   :  { %187 = vpush %v157_v57 }
  0xf9   :  { %s188_s20 = spop %187 }
  0xfa   :  { %s166_s21 = smul.f32 0.125, %s188_s20 }
  0xfc   :  { %168 = sst [smem:[#allocation11]] %s166_s21 }
  0xfd   :  { %177 = dma.smem_to_hbm %s326_s22, 16, %s175_s19, [#allocation5]  }
  0xfe   :  { %320 = dma.done.wait [#allocation5], 16  }
  0xff   :  { %321 = vsyncadd [#allocation5], 4294967280 }
 0x100   :  { %182 = sfence }
 0x101   :  { %183 = vsyncpa [#allocation4], 1 }
 0x102   :  { %184 = vsyncpa [#allocation7], 1 }
 0x103   :  { %185 = vsyncpa [#allocation10], 1 }
 0x104   :  { %186 = vsyncpa [#allocation5], 1 }

</bundles_post_ra>
